<compile_context>
chip_gen: v7x
topology: tpu7x:2x2x1
jax: 0.10.0
libtpu: 0.0.40
codegen_flags: <defaults>
</compile_context>

<pallas_src>
import math
import functools

import jax
import jax.numpy as jnp
from jax import lax
from jax.experimental import pallas as pl
from jax.experimental.pallas import tpu as pltpu


def _pick_head_group(n_heads, d_head):
    """Smallest head-group whose width is a multiple of 128 lanes; else all heads."""
    for g in range(1, n_heads + 1):
        if n_heads % g == 0 and (g * d_head) % 128 == 0:
            return g
    return n_heads  # fallback: one group spanning the full feature dim D


def _group_block_diag(w, g):
    """w: (H, d, d) per-head (in, out) weights -> (H//g, g*d, g*d) block-diagonal."""
    H, d, _ = w.shape
    ng = H // g
    w = w.reshape(ng, g, d, d)
    mask = jnp.eye(g, dtype=w.dtype)                        # (g, g)
    full = w[:, :, :, None, :] * mask[None, :, None, :, None]  # (ng, g, d, g, d)
    return full.reshape(ng, g * d, g * d)


def _msa_kernel(x_ref, w_ref, b_ref, o_ref, *, heads_per_group, d_head, mxu_dtype):
    # x_ref: (1, N, gw)   one batch element, one head-group
    # w_ref: (1, gw, 3*gw)  block-diagonal fused qkv weights (q pre-scaled), mxu_dtype
    # b_ref: (1, 1, 3*gw)   fused qkv bias (q pre-scaled), f32
    # o_ref: (1, N, gw)
    gw = heads_per_group * d_head

    # Single lane-dense load of this group's slab; cast to the MXU dtype.
    xg = x_ref[0].astype(mxu_dtype)                                   # (N, gw)

    # Fused q/k/v projection for all heads in the group: one bf16 matmul,
    # f32 accumulation, f32 bias add.
    qkv = jnp.dot(xg, w_ref[0], preferred_element_type=jnp.float32)   # (N, 3*gw) f32
    qkv = qkv + b_ref[0]                                              # broadcast (1, 3*gw)

    outs = []
    for hh in range(heads_per_group):       # static; bounded (typically 1-2 heads)
        lo = hh * d_head
        q = qkv[:, lo:lo + d_head].astype(mxu_dtype)                  # carries 1/sqrt(d_head)
        k = qkv[:, gw + lo:gw + lo + d_head].astype(mxu_dtype)
        v = qkv[:, 2 * gw + lo:2 * gw + lo + d_head].astype(mxu_dtype)

        # scores = q @ k.T: contract the shared feature axis directly.
        s = lax.dot_general(q, k, (((1,), (1,)), ((), ())),
                            preferred_element_type=jnp.float32)       # (N, N) f32
        m = jnp.max(s, axis=-1, keepdims=True)
        p = jnp.exp(s - m)                                            # un-normalized probs
        l = jnp.sum(p, axis=-1, keepdims=True)

        oh = jnp.dot(p.astype(mxu_dtype), v,
                     preferred_element_type=jnp.float32)              # (N, d_head) f32
        # Normalize the small (N, d_head) output instead of the (N, N) matrix.
        outs.append(oh * pl.reciprocal(l, approx=True))

    out_g = outs[0] if len(outs) == 1 else jnp.concatenate(outs, axis=-1)
    o_ref[0] = out_g.astype(o_ref.dtype)                              # one lane-dense store


def my_msa(x, wq, wk, wv, bq, bk, bv, *, n_heads, mxu_dtype=jnp.bfloat16):
    """x: (B, N, D); w*: (H, d_head, d_head) in PyTorch (out, in) layout; b*: (H, d_head)."""
    B, N, D = x.shape
    assert D % n_heads == 0
    d_head = D // n_heads
    scale = 1.0 / math.sqrt(d_head)

    g = _pick_head_group(n_heads, d_head)
    n_groups = n_heads // g
    gw = g * d_head

    # (in, out) layout, softmax scale folded into q; block-diagonal per head-group.
    wq_t = jnp.transpose(wq, (0, 2, 1)) * scale
    wk_t = jnp.transpose(wk, (0, 2, 1))
    wv_t = jnp.transpose(wv, (0, 2, 1))
    wqkv = jnp.concatenate(
        [_group_block_diag(wq_t, g),
         _group_block_diag(wk_t, g),
         _group_block_diag(wv_t, g)], axis=-1).astype(mxu_dtype)      # (ng, gw, 3*gw)
    bqkv = jnp.concatenate(
        [(bq * scale).reshape(n_groups, gw),
         bk.reshape(n_groups, gw),
         bv.reshape(n_groups, gw)], axis=-1).reshape(n_groups, 1, 3 * gw).astype(jnp.float32)

    kernel = functools.partial(_msa_kernel, heads_per_group=g, d_head=d_head,
                               mxu_dtype=mxu_dtype)

    x_spec = pl.BlockSpec((1, N, gw), lambda gi, b: (b, 0, gi))
    w_spec = pl.BlockSpec((1, gw, 3 * gw), lambda gi, b: (gi, 0, 0))
    b_spec = pl.BlockSpec((1, 1, 3 * gw), lambda gi, b: (gi, 0, 0))
    o_spec = pl.BlockSpec((1, N, gw), lambda gi, b: (b, 0, gi))

    # Explicit scoped-VMEM budget: double-buffered blocks + f32 intermediates.
    bx = jnp.dtype(x.dtype).itemsize
    bm = jnp.dtype(mxu_dtype).itemsize
    working_set = (
        2 * 2 * N * gw * bx                 # x + o blocks, double-buffered
        + 2 * gw * 3 * gw * bm              # weight block, double-buffered
        + 2 * 3 * gw * 4                    # bias block, double-buffered
        + N * gw * bm                       # xg (mxu dtype)
        + N * 3 * gw * 4                    # qkv (f32)
        + 2 * N * N * 4                     # scores + p (f32)
        + N * gw * 4                        # per-group output accumulation (f32)
    )
    vmem_limit = int(min(48 * 1024 * 1024, max(16 * 1024 * 1024, 2 * working_set)))

    out = pl.pallas_call(
        kernel,
        out_shape=jax.ShapeDtypeStruct((B, N, D), x.dtype),
        grid_spec=pltpu.PrefetchScalarGridSpec(
            num_scalar_prefetch=0,
            grid=(n_groups, B),                       # weights grid-invariant on inner axis
            in_specs=[x_spec, w_spec, b_spec],
            out_specs=o_spec,
        ),
        compiler_params=pltpu.CompilerParams(
            dimension_semantics=("parallel", "parallel"),
            vmem_limit_bytes=vmem_limit),
    )(x, wqkv, bqkv)

    return out


def my_msa_reference(x, wq, wk, wv, bq, bk, bv, *, n_heads):
    """Pure-JAX f32 reference mirroring the PyTorch forward exactly."""
    B, N, D = x.shape
    d_head = D // n_heads
    outs = []
    for b in range(B):
        heads = []
        for h in range(n_heads):
            seq = x[b, :, h * d_head:(h + 1) * d_head]
            q = seq @ wq[h].T + bq[h]
            k = seq @ wk[h].T + bk[h]
            v = seq @ wv[h].T + bv[h]
            attn = jax.nn.softmax(q @ k.T / math.sqrt(d_head), axis=-1)
            heads.append(attn @ v)
        outs.append(jnp.concatenate(heads, axis=-1)[None])
    return jnp.concatenate(outs, axis=0)


if __name__ == "__main__":
    B, N, D, H = 2, 8, 32, 2
    d_head = D // H

    key = jax.random.PRNGKey(0)
    kx, kq, kk, kv, kbq, kbk, kbv = jax.random.split(key, 7)

    x = jax.random.normal(kx, (B, N, D), dtype=jnp.float32)

    # Deterministic PyTorch-Linear-style init: U(-1/sqrt(fan_in), 1/sqrt(fan_in))
    bound = 1.0 / math.sqrt(d_head)
    wq = jax.random.uniform(kq, (H, d_head, d_head), jnp.float32, -bound, bound)
    wk = jax.random.uniform(kk, (H, d_head, d_head), jnp.float32, -bound, bound)
    wv = jax.random.uniform(kv, (H, d_head, d_head), jnp.float32, -bound, bound)
    bq = jax.random.uniform(kbq, (H, d_head), jnp.float32, -bound, bound)
    bk = jax.random.uniform(kbk, (H, d_head), jnp.float32, -bound, bound)
    bv = jax.random.uniform(kbv, (H, d_head), jnp.float32, -bound, bound)

    out = my_msa(x, wq, wk, wv, bq, bk, bv, n_heads=H)
    out = jax.block_until_ready(out)

    ref = my_msa_reference(x, wq, wk, wv, bq, bk, bv, n_heads=H)
    assert out.shape == (B, N, D)
    # bf16 MXU operands (f32 accumulation) + approx reciprocal -> bf16-level tolerance.
    err = float(jnp.max(jnp.abs(out - ref)))
    assert jnp.allclose(out, ref, atol=3e-2, rtol=3e-2), err

    print("KERNEL_OK")
</pallas_src>

<mosaic_0001>
module attributes {stable_mosaic.version = 11 : i64} {
  func.func @_msa_kernel(%arg0: i32, %arg1: i32, %arg2: memref<1x8x32xf32, #tpu.memory_space<vmem>>, %arg3: memref<1x32x96xbf16, #tpu.memory_space<vmem>>, %arg4: memref<1x1x96xf32, #tpu.memory_space<vmem>>, %arg5: memref<1x8x32xf32, #tpu.memory_space<vmem>>) attributes {dimension_semantics = [#tpu.dimension_semantics<parallel>, #tpu.dimension_semantics<parallel>], iteration_bounds = array<i64: 1, 2>, scalar_prefetch = 0 : i64, scratch_operands = 0 : i64, tpu.core_type = #tpu.core_type<tc>, window_params = [{transform_indices = @transform_0, window_bounds = array<i64: 1, 8, 32>}, {transform_indices = @transform_1, window_bounds = array<i64: 1, 32, 96>}, {transform_indices = @transform_2, window_bounds = array<i64: 1, 1, 96>}, {transform_indices = @transform_3, window_bounds = array<i64: 1, 8, 32>}]} {
    %c0 = arith.constant 0 : index
    %c0_0 = arith.constant 0 : index
    %c0_1 = arith.constant 0 : index
    %0 = vector.load %arg2[%c0, %c0_0, %c0_1] : memref<1x8x32xf32, #tpu.memory_space<vmem>>, vector<1x8x32xf32>
    %1 = vector.shape_cast %0 : vector<1x8x32xf32> to vector<8x32xf32>
    %2 = arith.truncf %1 : vector<8x32xf32> to vector<8x32xbf16>
    %c0_2 = arith.constant 0 : index
    %c0_3 = arith.constant 0 : index
    %c0_4 = arith.constant 0 : index
    %3 = vector.load %arg3[%c0_2, %c0_3, %c0_4] : memref<1x32x96xbf16, #tpu.memory_space<vmem>>, vector<1x32x96xbf16>
    %4 = vector.shape_cast %3 : vector<1x32x96xbf16> to vector<32x96xbf16>
    %cst = arith.constant dense<0.000000e+00> : vector<8x96xf32>
    %5 = tpu.matmul %2, %4, %cst {dimension_numbers = #tpu.dot_dimension_numbers<[1], [0], [0], [1], [0, 0, 1, 1], [], []>} : vector<8x32xbf16>, vector<32x96xbf16>, vector<8x96xf32> -> vector<8x96xf32>
    %c0_5 = arith.constant 0 : index
    %c0_6 = arith.constant 0 : index
    %c0_7 = arith.constant 0 : index
    %6 = vector.load %arg4[%c0_5, %c0_6, %c0_7] : memref<1x1x96xf32, #tpu.memory_space<vmem>>, vector<1x1x96xf32>
    %7 = vector.shape_cast %6 : vector<1x1x96xf32> to vector<1x96xf32>
    %8 = vector.broadcast %7 : vector<1x96xf32> to vector<8x96xf32>
    %9 = arith.addf %5, %8 : vector<8x96xf32>
    %10 = vector.extract_strided_slice %9 {offsets = [0, 0], sizes = [8, 16], strides = [1, 1]} : vector<8x96xf32> to vector<8x16xf32>
    %11 = arith.truncf %10 : vector<8x16xf32> to vector<8x16xbf16>
    %12 = vector.extract_strided_slice %9 {offsets = [0, 32], sizes = [8, 16], strides = [1, 1]} : vector<8x96xf32> to vector<8x16xf32>
    %13 = arith.truncf %12 : vector<8x16xf32> to vector<8x16xbf16>
    %14 = vector.extract_strided_slice %9 {offsets = [0, 64], sizes = [8, 16], strides = [1, 1]} : vector<8x96xf32> to vector<8x16xf32>
    %15 = arith.truncf %14 : vector<8x16xf32> to vector<8x16xbf16>
    %cst_8 = arith.constant dense<0.000000e+00> : vector<8x8xf32>
    %16 = tpu.matmul %11, %13, %cst_8 {dimension_numbers = #tpu.dot_dimension_numbers<[1], [1], [0], [0], [0, 0, 1, 0], [], []>} : vector<8x16xbf16>, vector<8x16xbf16>, vector<8x8xf32> -> vector<8x8xf32>
    %cst_9 = arith.constant dense<0xFF800000> : vector<8xf32>
    %17 = vector.multi_reduction <maximumf>, %16, %cst_9 [1] : vector<8x8xf32> to vector<8xf32>
    %18 = vector.shape_cast %17 : vector<8xf32> to vector<8x1xf32>
    %19 = vector.broadcast %18 : vector<8x1xf32> to vector<8x8xf32>
    %20 = arith.subf %16, %19 : vector<8x8xf32>
    %21 = math.exp %20 : vector<8x8xf32>
    %cst_10 = arith.constant dense<0.000000e+00> : vector<8xf32>
    %22 = vector.multi_reduction <add>, %21, %cst_10 [1] : vector<8x8xf32> to vector<8xf32>
    %23 = vector.shape_cast %22 : vector<8xf32> to vector<8x1xf32>
    %24 = arith.truncf %21 : vector<8x8xf32> to vector<8x8xbf16>
    %cst_11 = arith.constant dense<0.000000e+00> : vector<8x16xf32>
    %25 = tpu.matmul %24, %15, %cst_11 {dimension_numbers = #tpu.dot_dimension_numbers<[1], [0], [0], [1], [0, 0, 1, 1], [], []>} : vector<8x8xbf16>, vector<8x16xbf16>, vector<8x16xf32> -> vector<8x16xf32>
    %26 = tpu.reciprocal %23 {approx = true} : vector<8x1xf32> -> vector<8x1xf32>
    %27 = vector.broadcast %26 : vector<8x1xf32> to vector<8x16xf32>
    %28 = arith.mulf %25, %27 : vector<8x16xf32>
    %29 = vector.extract_strided_slice %9 {offsets = [0, 16], sizes = [8, 16], strides = [1, 1]} : vector<8x96xf32> to vector<8x16xf32>
    %30 = arith.truncf %29 : vector<8x16xf32> to vector<8x16xbf16>
    %31 = vector.extract_strided_slice %9 {offsets = [0, 48], sizes = [8, 16], strides = [1, 1]} : vector<8x96xf32> to vector<8x16xf32>
    %32 = arith.truncf %31 : vector<8x16xf32> to vector<8x16xbf16>
    %33 = vector.extract_strided_slice %9 {offsets = [0, 80], sizes = [8, 16], strides = [1, 1]} : vector<8x96xf32> to vector<8x16xf32>
    %34 = arith.truncf %33 : vector<8x16xf32> to vector<8x16xbf16>
    %cst_12 = arith.constant dense<0.000000e+00> : vector<8x8xf32>
    %35 = tpu.matmul %30, %32, %cst_12 {dimension_numbers = #tpu.dot_dimension_numbers<[1], [1], [0], [0], [0, 0, 1, 0], [], []>} : vector<8x16xbf16>, vector<8x16xbf16>, vector<8x8xf32> -> vector<8x8xf32>
    %cst_13 = arith.constant dense<0xFF800000> : vector<8xf32>
    %36 = vector.multi_reduction <maximumf>, %35, %cst_13 [1] : vector<8x8xf32> to vector<8xf32>
    %37 = vector.shape_cast %36 : vector<8xf32> to vector<8x1xf32>
    %38 = vector.broadcast %37 : vector<8x1xf32> to vector<8x8xf32>
    %39 = arith.subf %35, %38 : vector<8x8xf32>
    %40 = math.exp %39 : vector<8x8xf32>
    %cst_14 = arith.constant dense<0.000000e+00> : vector<8xf32>
    %41 = vector.multi_reduction <add>, %40, %cst_14 [1] : vector<8x8xf32> to vector<8xf32>
    %42 = vector.shape_cast %41 : vector<8xf32> to vector<8x1xf32>
    %43 = arith.truncf %40 : vector<8x8xf32> to vector<8x8xbf16>
    %cst_15 = arith.constant dense<0.000000e+00> : vector<8x16xf32>
    %44 = tpu.matmul %43, %34, %cst_15 {dimension_numbers = #tpu.dot_dimension_numbers<[1], [0], [0], [1], [0, 0, 1, 1], [], []>} : vector<8x8xbf16>, vector<8x16xbf16>, vector<8x16xf32> -> vector<8x16xf32>
    %45 = tpu.reciprocal %42 {approx = true} : vector<8x1xf32> -> vector<8x1xf32>
    %46 = vector.broadcast %45 : vector<8x1xf32> to vector<8x16xf32>
    %47 = arith.mulf %44, %46 : vector<8x16xf32>
    %48 = tpu.concatenate %28, %47 in 1 : vector<8x16xf32>, vector<8x16xf32> -> vector<8x32xf32>
    %c0_16 = arith.constant 0 : index
    %c0_17 = arith.constant 0 : index
    %c0_18 = arith.constant 0 : index
    %49 = vector.load %arg5[%c0_16, %c0_17, %c0_18] : memref<1x8x32xf32, #tpu.memory_space<vmem>>, vector<1x8x32xf32>
    %50 = vector.shape_cast %49 : vector<1x8x32xf32> to vector<8x32xf32>
    %51 = vector.shape_cast %48 : vector<8x32xf32> to vector<1x8x32xf32>
    tpu.vector_store %arg5[%c0_16, %c0_17, %c0_18], %51 {strides = array<i32>} : memref<1x8x32xf32, #tpu.memory_space<vmem>>, vector<1x8x32xf32>,
    return
  }
  func.func @transform_0(%arg0: i32, %arg1: i32) -> (i32, i32, i32) {
    %c0_i32 = arith.constant 0 : i32
    %c0_i32_0 = arith.constant 0 : i32
    return %arg1, %c0_i32, %arg0 : i32, i32, i32
  }
  func.func @transform_1(%arg0: i32, %arg1: i32) -> (i32, i32, i32) {
    %c0_i32 = arith.constant 0 : i32
    %c0_i32_0 = arith.constant 0 : i32
    %c0_i32_1 = arith.constant 0 : i32
    return %arg0, %c0_i32, %c0_i32_0 : i32, i32, i32
  }
  func.func @transform_2(%arg0: i32, %arg1: i32) -> (i32, i32, i32) {
    %c0_i32 = arith.constant 0 : i32
    %c0_i32_0 = arith.constant 0 : i32
    %c0_i32_1 = arith.constant 0 : i32
    return %arg0, %c0_i32, %c0_i32_0 : i32, i32, i32
  }
  func.func @transform_3(%arg0: i32, %arg1: i32) -> (i32, i32, i32) {
    %c0_i32 = arith.constant 0 : i32
    %c0_i32_0 = arith.constant 0 : i32
    return %arg1, %c0_i32, %arg0 : i32, i32, i32
  }
}

</mosaic_0001>

<bundles_post_ra>
// kernel: tpu_custom_call.1
= control target key start
LH: loop header
LB: loop body
LE: loop exit
PB: predicated region body
PF: predicated region fallthrough
CT: control target
= control target key end

     0   :  { %8 = vsyncpa [#allocation3], 0  ;;  %s1247_s0 = inlined_call_operand.hbm [shape: f32[2,8,32], index: 0, kind: input, shape index: {}]   ;;  %s1248_s1 = inlined_call_operand.hbm [shape: bf16[1,32,96], index: 1, kind: input, shape index: {}]   ;;  %s1249_s2 = inlined_call_operand.vmem [shape: f32[1,1,96], index: 2, kind: input, shape index: {}]   ;;  %s1250_s3 = inlined_call_operand.hbm [shape: f32[2,8,32], index: 3, kind: output, shape index: {}]  }
   0x1   :  { %10 = vsyncpa [#allocation3 + $0x1], 0 }
   0x2   :  { %11 = vsyncpa [#allocation6], 0 }
   0x3   :  { %12 = vsyncpa [#allocation4], 0 }
   0x4   :  { %14 = vsyncpa [#allocation4 + $0x1], 0  ;;  %s997_s12 = smov 0   ;;  %s999_s13 = smov 0  }
   0x5   :  { %s1001_s14 = smov 0   ;;  %s1003_s15 = smov 0  }
   0x6   :  { %s1005_s16 = smov 0   ;;  %s1007_s17 = smov 0  }
   0x7 LB: > { %s658_s18 = sadd.s32 4294967295, %s962_s17   ;;  %s659_s19 = sadd.s32 4294967294, %s962_s17   ;;  %s962_s17 = sphi %s1007_s17, %s20_s17   ;;  %s958_s16 = sphi %s1005_s16, %s1274_s16   ;;  %s954_s15 = sphi %s1003_s15, %s1273_s15   ;;  %s950_s14 = sphi %s1001_s14, %s1272_s14   ;;  %s946_s13 = sphi %s999_s13, %s1271_s13   ;;  %s942_s12 = sphi %s997_s12, %s1270_s12  }
   0x8   : > { %p54_p0 = scmp.ne.s32.totalorder %s946_s13, %s942_s12  ;;  %p1031_p1 = scmp.eq.s32.totalorder %s658_s18, 0 }
   0x9   : > { %p1035_p2 = scmp.eq.s32.totalorder %s658_s18, 1  ;;  %p138_p3 = scmp.eq.s32.totalorder %s659_s19, 1 }
   0xa   : > { %s1255_s20 = scalar_select %p1031_p1, 1, 0 }
   0xb   : > { %s1256_s21 = scalar_select %p1035_p2, 1, 0 }
   0xc   : > { %p1041_p4 = por %p1031_p1, %p54_p0  ;;  %p660_p5 = scmp.ge.s32.totalorder %s962_s17, 1 }
   0xd   : > { %p1046_p6 = por %p138_p3, %p54_p0  ;;  %p145_p7 = scmp.lt.s32.totalorder %s962_s17, 3 }
   0xe   : > { %s1257_s22 = scalar_select %p1041_p4, 1, 0 }
   0xf   : > { %s1258_s23 = scalar_select %p1046_p6, 1, 0 }
  0x10   : > { %p1051_p8 = pnand %p660_p5, %p145_p7  ;;  %s964_s25 = smov [#allocation5]  }
  0x11   : > { %s160_s26 = sshll.u32 %s964_s25, 4  ;;  %s29_s28 = sadd.s32 1, %s958_s16  ;;  %s161_s26 = int_to_ptr.vmem [resolvable:$true] %s160_s26 }
  0x12   : > { %s1259_s24 = scalar_select %p1051_p8, 1, 0 }
  0x13   : > { %p733_p9 = pneg %p1051_p8  ;;  %s818_s4 = scalar_lea.hbm %s1248_s1, 256 }
  0x14   : > { %p819_p12 = scmp.ne.s32.totalorder %s1248_s1, %s818_s4  ;;  %p825_p5 = scmp.lt.u32.totalorder %s818_s4, %s1248_s1 }
  0x15   : > { %p1060_p11 = pnand %p733_p9, %p1031_p1 }
  0x17   : > { %p820_p13 = pneg %p1060_p11 }
  0x19   : > { %p821_p0 = pnand %p820_p13, %p819_p12 }
  0x1b   : > { %p822_p3 = pneg %p821_p0 }
  0x1d   : > { %p827_p7 = pnand %p825_p5, %p822_p3 }
  0x1f   : > { %830 = shalt.err (!%p827_p7)
}
  0x20   : > { %s831_s9 = scalar_lea.vmem %s161_s26, 256  ;;  %p839_p1 = scmp.lt.s32.totalorder %s161_s26, %s161_s26 }
  0x21   : > { %p832_p9 = scmp.ne.s32.totalorder %s161_s26, %s831_s9  ;;  %p840_p4 = scmp.lt.s32.totalorder %s831_s9, %s831_s9 }
  0x23   : > { %p834_p10 = pnand %p832_p9, %p820_p13  ;;  %p841_p8 = por %p840_p4, %p839_p1 }
  0x25   : > { %p835_p6 = pneg %p834_p10 }
  0x27   : > { %p842_p2 = pnand %p841_p8, %p835_p6 }
  0x29   : > { %845 = shalt.err (!%p842_p2)
}
  0x2a   : > { %s965_s10 = smov 64   ;;  %s966_s11 = smov 4  }
  0x2b   : > { %736 = dma.hbm_to_vmem [thread:$0]  (!%p1060_p11), %s1248_s1, 256, %s161_s26, [#allocation6], %s965_s10, %s965_s10, %s966_s11  }
  0x2c   : > { %p30_p1 = scmp.ge.s32.totalorder %s29_s28, 2  ;;  %s41_s25 = sadd.s32 1, %s950_s14 }
  0x2d   : > { %p48_p2 = scmp.ne.s32.totalorder %s950_s14, %s946_s13  ;;  %p49_p4 = scmp.eq.s32.totalorder %s962_s17, 0 }
  0x2e   : > { %s1276_s28 = smov (%p30_p1, %s29_s28), 0  ;;  %p1262_p8 = scmp.ne.s32.totalorder %s1256_s21, 0 }
  0x2f   : > { %p1087_p6 = por %p49_p4, %p48_p2  ;;  %s36_s27 = ssub.s32 %s958_s16, %s1276_s28 }
  0x30   : > { %p1093_p10 = por %p1262_p8, %p48_p2  ;;  %p746_p12 = scmp.lt.s32.totalorder %s962_s17, 2 }
  0x31   : > { %p39_p11 = scmp.eq.s32.totalorder %s36_s27, 0  ;;  %s180_s26 = sand.u32 1, %s950_s14  }
  0x32   : > { %s664_s4 = sshll.u32 %s180_s26, 3  ;;  %s665_s6 = sshll.u32 %s958_s16, 7 }
  0x33   : > { %s1102_s5 = scalar_select %p39_p11, %s950_s14, %s41_s25  }
  0x34   : > { %s1108_s9 = scalar_lea.hbm %s1247_s0, %s665_s6  ;;  %s184_s21 = scalar_lea.vmem [#allocation2], %s664_s4 }
  0x35   : > { %s192_s10 = sshll.u32 %s184_s21, 4  ;;  %p1114_p13 = pnand %p746_p12, %p1087_p6  ;;  %s1110_s10 = int_to_ptr.vmem [resolvable:$true] %s192_s10 }
  0x36   : > { %s181_s18 = scalar_lea.sflag [#allocation3], %s180_s26  ;;  %s846_s19 = scalar_lea.hbm %s1108_s9, 128 }
  0x37   : > { %p847_p0 = scmp.ne.s32.totalorder %s1108_s9, %s846_s19  ;;  %p848_p3 = pneg %p1114_p13 }
  0x38   : > { %s851_s4 = scalar_lea.hbm %s1247_s0, 256  ;;  %p852_p9 = scmp.lt.u32.totalorder %s1108_s9, %s1247_s0 }
  0x39   : > { %p849_p5 = pnand %p848_p3, %p847_p0  ;;  %p853_p1 = scmp.lt.u32.totalorder %s851_s4, %s846_s19 }
  0x3a   : > { %p855_p4 = scmp.lt.u32.totalorder %s846_s19, %s1108_s9 }
  0x3b   : > { %p850_p7 = pneg %p849_p5  ;;  %p854_p2 = por %p853_p1, %p852_p9 }
  0x3d   : > { %p856_p6 = por %p855_p4, %p854_p2 }
  0x3f   : > { %p857_p8 = pnand %p856_p6, %p850_p7 }
  0x41   : > { %860 = shalt.err (!%p857_p8)
}
  0x42   : > { %s861_s26 = scalar_lea.vmem %s1110_s10, 128  ;;  %s967_s7 = smov [#allocation2]  }
  0x43   : > { %p862_p12 = scmp.ne.s32.totalorder %s1110_s10, %s861_s26  ;;  %s866_s8 = sshll.u32 %s967_s7, 4  ;;  %s867_s8 = int_to_ptr.vmem [resolvable:$false] %s866_s8 }
  0x44   : > { %s868_s21 = scalar_lea.vmem %s867_s8, 256  ;;  %p869_p5 = scmp.lt.s32.totalorder %s1110_s10, %s867_s8 }
  0x45   : > { %p864_p11 = pnand %p862_p12, %p848_p3  ;;  %p870_p9 = scmp.lt.s32.totalorder %s868_s21, %s861_s26 }
  0x47   : > { %p865_p0 = pneg %p864_p11  ;;  %p871_p1 = por %p870_p9, %p869_p5 }
  0x49   : > { %p872_p2 = pnand %p871_p1, %p865_p0 }
  0x4b   : > { %875 = shalt.err (!%p872_p2)
}
  0x4c   : > { %740 = dma.hbm_to_vmem [thread:$0]  (!%p1114_p13), %s1108_s9, 128, %s1110_s10, %s181_s18  }
  0x4d   : > { %p1265_p7 = scmp.ne.s32.totalorder %s1259_s24, 0 }
  0x4e   : > { %s1146_s19 = sand.u32 (!%p1265_p7), 1, %s946_s13   ;;  %p1266_p3 = scmp.ne.s32.totalorder (!%p1265_p7), %s1257_s22, 0 }
  0x4f   : > { %201 = sbr.rel (%p1265_p7) target bundleno = 1163 (0x48b), region = 32  ;;  %s667_s25 = sshll.u32 (!%p1265_p7), %s1146_s19, 3 }
  0x50   : > { %s204_s27 = scalar_lea.sflag (!%p1265_p7), [#allocation3], %s1146_s19  ;;  %s207_s4 = scalar_lea.vmem (!%p1265_p7), [#allocation2], %s667_s25 }
  0x56   : > { %929 = dma.done.wait (%p1266_p3), %s204_s27, 128  }
  0x57   : > { %931 = vsyncadd (%p1266_p3), %s204_s27, 4294967168  ;;  %p1267_p13 = scmp.ne.s32.totalorder %s1255_s20, 0 }
  0x59   : > { %933 = dma.done.wait (%p1267_p13), [#allocation6], 256  }
  0x5a   : > { %935 = vsyncadd (%p1267_p13), [#allocation6], 4294967040  ;;  %v968_v0 = vmov 0.0   ;;  %vm969_vm0 = vmmov 0   ;;  %v808_v1 = vld [vmem:[#allocation5] sm:$0xff]   ;;  %v809_v2 = vld [vmem:[#allocation5 + $0x8] sm:$0xff]  }
  0x5b   : > { %693 = vmatprep.subr.bf16.mxu0 %v968_v0  ;;  %697 = vmatprep.mubr.msk.bf16.mxu0 %vm969_vm0, %v968_v0  ;;  %v241_v3 = vld [vmem:[%s207_s4] sm:$0xff]  ;;  %vm266_vm1 = vcmask 261120   ;;  %s970_s24 = smov 112   ;;  %s971_s9 = smov 96   ;;  %vm314_vm2 = vcmask 130048   ;;  %vm361_vm3 = vcmask 64512  }
  0x5c   : > { %701 = vmatprep.subr.bf16.mxu1 %v968_v0  ;;  %703 = vmatprep.mubr.msk.bf16.mxu1 %vm969_vm0, %v968_v0  ;;  %v242_v4 = vpack.c.bf16 %v241_v3, %v241_v3  ;;  %v670_v5 = vld [vmem:[%s1249_s2] ss:$0 sm:$0xff]  ;;  %s972_s10 = smov 80   ;;  %s973_s11 = smov 48   ;;  %vm377_vm4 = vcmask 1043456  }
  0x5d   : > { %694 = vmatpush3.bf16.msra.mxu0 %v808_v1  ;;  %s974_s18 = smov 64   ;;  %s975_s29 = smov 16  }
  0x5e   : > { %695 = vmatprep.subr.bf16.mxu0 %v968_v0  ;;  %s679_s6 = sshll.u32 %s954_s15, 7  ;;  %s236_s26 = scalar_lea.vmem [#allocation7], %s667_s25 }
  0x5f   : > { %s554_s7 = sshll.u32 %s236_s26, 4  ;;  %s1196_s27 = scalar_lea.hbm %s1250_s3, %s679_s6  ;;  %s1198_s7 = int_to_ptr.vmem [resolvable:$true] %s554_s7 }
  0x60   : > { %s540_s15 = scalar_lea.sflag [#allocation4], %s1146_s19  ;;  %s876_s25 = scalar_lea.vmem %s1198_s7, 128 }
  0x61   : > { %696 = vmatpush3.bf16.msra.mxu0 %v809_v2  ;;  %p877_p4 = scmp.ne.s32.totalorder %s1198_s7, %s876_s25  ;;  %s976_s4 = smov [#allocation7]  }
  0x62   : > { %707 = vmatprep.subr.bf16.mxu0 %v968_v0  ;;  %s880_s20 = sshll.u32 %s976_s4, 4  ;;  %s881_s20 = int_to_ptr.vmem [resolvable:$false] %s880_s20 }
  0x63   : > { %p878_p6 = pnand %p877_p4, %p1093_p10  ;;  %s882_s22 = scalar_lea.vmem %s881_s20, 256 }
  0x64   : > { %698 = vmatmul.mubr.msk.bf16.vlgmr.msra.gmra.mrb[0].mxu0 %vm266_vm1, %v242_v4  ;;  %p883_p12 = scmp.lt.s32.totalorder %s1198_s7, %s881_s20  ;;  %p884_p11 = scmp.lt.s32.totalorder %s882_s22, %s876_s25 }
  0x65   : > { %709 = vmatprep.mubr.msk.bf16.mxu0 %vm969_vm0, %v968_v0  ;;  %p879_p8 = pneg %p878_p6 }
  0x66   : > { %p885_p0 = por %p884_p11, %p883_p12 }
  0x68   : > { %p886_p5 = pnand %p885_p0, %p879_p8 }
 0x137   : > { %v304_v6 = vpop.f32.mrb[0].mxu0 }
 0x138   : > { %v305_v7 = vadd.f32 %v670_v5, %v304_v6  ;;  %v699_v8 = vpop.f32.mrb[1].mxu0 }
 0x139   : > { %v307_v9 = vpop.f32.mrb[2].mxu0 }
 0x13a   : > { %v310_v10 = vpack.c.bf16 %v305_v7, %v305_v7  ;;  %v700_v11 = vpop.f32.mrb[3].mxu0 }
 0x13c   : > { %423 = vrot.lane.b32.xlu1 %v310_v10, %s970_s24  ;;  %312 = vrot.lane.b32.xlu0 %v310_v10, %s971_s9 }
 0x140   : > { %425 = vrot.lane.b32.xlu0 %v310_v10, %s972_s10 }
 0x1ae   : > { %v313_v12 = vpop.permute.xlu0 %312  ;;  %v424_v16 = vpop.permute.xlu1 %423 }
 0x1af   : > { %v319_v13 = vsel %vm314_vm2, %v313_v12, 0 }
 0x1b0   : > { %702 = vmatpush3.bf16.xpose.msra.mxu1 %v319_v13 }
 0x1b1   : > { %713 = vmatprep.subr.bf16.mxu1 %v968_v0 }
 0x1b2   : > { %v426_v14 = vpop.permute.xlu0 %425 }
 0x1b3   : > { %v431_v15 = vsel %vm314_vm2, %v426_v14, 0 }
 0x1b7   : > { %704 = vmatmul.mubr.msk.bf16.vlgmr.msra.gmra.mrb[0].mxu1 %vm314_vm2, %v310_v10 }
 0x1b8   : > { %714 = vmatpush3.bf16.xpose.msra.mxu1 %v431_v15  ;;  %715 = vmatprep.mubr.msk.bf16.mxu1 %vm969_vm0, %v968_v0 }
 0x1bf   : > { %716 = vmatmul.mubr.msk.bf16.vlgmr.msra.gmra.mrb[4].mxu1 %vm314_vm2, %v424_v16 }
 0x28a   : > { %v355_v17 = vpop.f32.mrb[0].mxu1 }
 0x28b   : > { %v705_v18 = vpop.f32.mrb[1].mxu1  ;;  %v362_v19 = vsel %vm361_vm3, %v355_v17, -inf }
 0x28c   : > { %363 = vmax.xlane.f32.xlu1 %v362_v19  ;;  %v358_v20 = vpop.f32.mrb[2].mxu1 }
 0x28d   : > { %v706_v21 = vpop.f32.mrb[3].mxu1 }
 0x292   : > { %v467_v22 = vpop.f32.mrb[4].mxu1 }
 0x293   : > { %v717_v23 = vpop.f32.mrb[5].mxu1  ;;  %v473_v24 = vsel %vm361_vm3, %v467_v22, -inf }
 0x294   : > { %474 = vmax.xlane.f32.xlu0 %v473_v24  ;;  %v470_v25 = vpop.f32.mrb[6].mxu1 }
 0x295   : > { %v718_v26 = vpop.f32.mrb[7].mxu1 }
 0x29d   : > { %483 = vrot.lane.b32.xlu1 %v310_v10, %s973_s11 }
 0x2aa   : > { %372 = vrot.lane.b32.xlu0 %v310_v10, %s974_s18 }
 0x319   : > { %v364_v27 = vpop.xlane.xlu1 %363 }
 0x31a   : > { %v365_v28 = vsub.f32 %v355_v17, %v364_v27 }
 0x31c   : > { %v366_v29 = vmul.f32 1.442695, %v365_v28 }
 0x31d   : > { %v484_v36 = vpop.permute.xlu1 %483 }
 0x31e   : > { %810 = vpow2.f32 %v366_v29  ;;  %v489_v39 = vsel %vm377_vm4, %v484_v36, 0 }
 0x321   : > { %v475_v30 = vpop.xlane.xlu0 %474 }
 0x322   : > { %v476_v31 = vsub.f32 %v467_v22, %v475_v30 }
 0x324   : > { %v477_v32 = vmul.f32 1.442695, %v476_v31 }
 0x325   : > { %v373_v33 = vpop.permute.xlu0 %372 }
 0x326   : > { %812 = vpow2.f32 %v477_v32  ;;  %v379_v34 = vsel %vm377_vm4, %v373_v33, 0 }
 0x327   : > { %708 = vmatpush3.bf16.msra.mxu0 %v379_v34 }
 0x328   : > { %v811_v35 = vpop.eup %810  ;;  %719 = vmatprep.subr.bf16.mxu0 %v968_v0 }
 0x329   : > { %v368_v37 = vsel %vm361_vm3, %v811_v35, 0.0  ;;  %v371_v38 = vpack.c.bf16 %v811_v35, %v811_v35 }
 0x32a   : > { %369 = vadd.xlane.f32.xlu0 %v368_v37 }
 0x32b   : > { %710 = vmatmul.mubr.msk.bf16.vlgmr.msra.gmra.mrb[4].mxu0 %vm361_vm3, %v371_v38 }
 0x32c   : > { %720 = vmatpush3.bf16.msra.mxu0 %v489_v39  ;;  %721 = vmatprep.mubr.msk.bf16.mxu0 %vm969_vm0, %v968_v0 }
 0x330   : > { %v813_v40 = vpop.eup %812 }
 0x331   : > { %v479_v41 = vsel %vm361_vm3, %v813_v40, 0.0  ;;  %v482_v42 = vpack.c.bf16 %v813_v40, %v813_v40 }
 0x332   : > { %480 = vadd.xlane.f32.xlu1 %v479_v41 }
 0x333   : > { %722 = vmatmul.mubr.msk.bf16.vlgmr.msra.gmra.mrb[8].mxu0 %vm361_vm3, %v482_v42 }
 0x3b7   : > { %v370_v54 = vpop.xlane.xlu0 %369 }
 0x3bf   : > { %v481_v43 = vpop.xlane.xlu1 %480 }
 0x3c0   : > { %814 = vrcp.f32 %v481_v43 }
 0x3c1   : > { %816 = vrcp.f32 %v370_v54 }
 0x3ca   : > { %v815_v48 = vpop.eup %814 }
 0x3cb   : > { %v817_v55 = vpop.eup %816 }
 0x3fe   : > { %v415_v44 = vpop.f32.mrb[4].mxu0 }
 0x3ff   : > { %v711_v45 = vpop.f32.mrb[5].mxu0  ;;  %v422_v56 = vmul.f32 %v817_v55, %v415_v44 }
 0x400   : > { %v418_v46 = vpop.f32.mrb[6].mxu0 }
 0x401   : > { %v712_v47 = vpop.f32.mrb[7].mxu0 }
 0x406   : > { %v525_v49 = vpop.f32.mrb[8].mxu0 }
 0x407   : > { %v532_v50 = vmul.f32 %v815_v48, %v525_v49  ;;  %v723_v51 = vpop.f32.mrb[9].mxu0 }
 0x408   : > { %v528_v52 = vpop.f32.mrb[10].mxu0 }
 0x409   : > { %534 = vrot.lane.b32.xlu0 %v532_v50, %s975_s29  ;;  %v724_v53 = vpop.f32.mrb[11].mxu0 }
 0x47b   : > { %v535_v57 = vpop.permute.xlu0 %534 }
 0x47c   : > { %v537_v58 = vsel %vm314_vm2, %v422_v56, %v535_v57 }
 0x47d   : > { %538 = vst.msk [vmem:[%s236_s26] sm:$0xff] %vm266_vm1, %v537_v58 }
 0x47e   : > { %889 = shalt.err (!%p886_p5)
}
 0x47f   : > { %s890_s19 = scalar_lea.hbm %s1196_s27, 128  ;;  %s894_s10 = scalar_lea.hbm %s1250_s3, 256 }
 0x480   : > { %p891_p9 = scmp.ne.s32.totalorder %s1196_s27, %s890_s19  ;;  %p895_p7 = scmp.lt.u32.totalorder %s1196_s27, %s1250_s3 }
 0x481   : > { %p896_p3 = scmp.lt.u32.totalorder %s894_s10, %s890_s19  ;;  %p898_p4 = scmp.lt.u32.totalorder %s890_s19, %s1196_s27 }
 0x482   : > { %p892_p1 = pnand %p891_p9, %p1093_p10 }
 0x483   : > { %p897_p13 = por %p896_p3, %p895_p7 }
 0x484   : > { %p893_p2 = pneg %p892_p1 }
 0x485   : > { %p899_p6 = por %p898_p4, %p897_p13 }
 0x487   : > { %p900_p8 = pnand %p899_p6, %p893_p2 }
 0x489   : > { %903 = shalt.err (!%p900_p8)
}
 0x48a   : > { %731 = dma.vmem_to_hbm [thread:$0]  (%p1093_p10), %s1198_s7, 128, %s1196_s27, %s540_s15  }
 0x48b PF: > { %s566_s29 = sand.u32 1, %s942_s12   ;;  %p1268_p12 = scmp.ne.s32.totalorder %s1258_s23, 0 }
 0x48c   : > { %p1269_p11 = scmp.ge.s32.totalorder %s962_s17, 2  ;;  %s567_s6 = scalar_lea.sflag [#allocation4], %s566_s29 }
 0x48e   : > { %p742_p0 = pnand %p1269_p11, %p1268_p12 }
 0x490   : > { %937 = dma.done.wait (!%p742_p0), %s567_s6, 128  }
 0x491   : > { %939 = vsyncadd (!%p742_p0), %s567_s6, 4294967168  ;;  %s20_s17 = sadd.s32 1, %s962_s17   ;;  %s1270_s12 = smov %s946_s13 }
 0x492   : > { %p17_p5 = scmp.ge.s32.totalorder %s20_s17, 4   ;;  %s1271_s13 = smov %s950_s14 }
 0x493   : > { %s1272_s14 = smov %s1102_s5  ;;  %s1273_s15 = smov %s958_s16 }
 0x494   : > { %s1274_s16 = smov %s1276_s28  ;;  %19 = sbr.rel (!%p17_p5) target bundleno = 7 (0x7), region = 85 }
 0x49b   :  { %572 = vsyncpa [#allocation3], 1 }
 0x49c   :  { %574 = vsyncpa [#allocation3 + $0x1], 1 }
 0x49d   :  { %575 = vsyncpa [#allocation6], 1 }
 0x49e   :  { %576 = vsyncpa [#allocation4], 1 }
 0x49f   :  { %578 = vsyncpa [#allocation4 + $0x1], 1 }

</bundles_post_ra>
